<compile_context>
chip_gen: v6e
topology: v6e:2x2x1
jax: 0.10.0
libtpu: 0.0.40
codegen_flags: <defaults>
</compile_context>

<pallas_src>
import functools

import jax
import jax.numpy as jnp
from jax.experimental import pallas as pl
from jax.experimental.pallas import tpu as pltpu


def _fused_autoencoder_kernel(*refs, acts):
    """Fused forward: x -> [Linear + act] * n_layers -> out, all in VMEM.

    refs = (x_ref, W0_ref, b0_ref, W1_ref, b1_ref, ..., o_ref)
    Weights are bf16 (MXU inputs); biases and all elementwise math are f32.
    """
    n_layers = len(acts)
    x_ref = refs[0]
    o_ref = refs[1 + 2 * n_layers]

    h = x_ref[...].astype(jnp.bfloat16)  # MXU input for the first layer
    for l in range(n_layers):  # unrolled at trace time
        w_ref = refs[1 + 2 * l]
        b_ref = refs[2 + 2 * l]
        # bf16 x bf16 -> f32 accumulate on the MXU.
        y = jnp.dot(h, w_ref[...], preferred_element_type=jnp.float32)
        y = y + b_ref[...]  # (1, Dout) bias broadcasts over batch rows; f32
        if acts[l] == "relu":
            y = jnp.maximum(y, 0.0)
        elif acts[l] == "sigmoid":
            y = jax.nn.sigmoid(y)  # exp goes to the EUP slot
        else:
            raise ValueError(f"unknown activation: {acts[l]}")
        if l < n_layers - 1:
            h = y.astype(jnp.bfloat16)  # stays in vregs/VMEM, never hits HBM
        else:
            o_ref[...] = y.astype(o_ref.dtype)


def _round_up(n, m):
    return ((n + m - 1) // m) * m


def autoencoder_forward(x, enc_params, dec_params):
    """x: [B, Din]; enc/dec params: lists of (W[in, out], b[out])."""
    layers = list(enc_params) + list(dec_params)
    n_layers = len(layers)
    # Encoder: all ReLU.  Decoder: ReLU except the final layer, which is Sigmoid.
    acts = tuple("relu" for _ in range(n_layers - 1)) + ("sigmoid",)

    B, Din = x.shape
    Dout_final = layers[-1][0].shape[1]

    # Batch tile: as large as reasonable (big tiles amortize per-step overhead),
    # always a multiple of 8 so the (8, 128) BlockSpec constraint holds.
    TB = min(512, _round_up(B, 8))
    B_pad = _round_up(B, TB)
    x_in = x if B_pad == B else jnp.pad(x, ((0, B_pad - B), (0, 0)))
    grid = (B_pad // TB,)

    in_specs = [pl.BlockSpec((TB, Din), lambda i: (i, 0))]
    inputs = [x_in]
    for (W, b) in layers:
        din, dout = W.shape
        # Whole-array blocks with index_map -> (0, 0): DMA'd once, then
        # VMEM-resident across every batch-grid step.
        in_specs.append(pl.BlockSpec((din, dout), lambda i: (0, 0)))
        in_specs.append(pl.BlockSpec((1, dout), lambda i: (0, 0)))
        inputs.append(W.astype(jnp.bfloat16))                   # MXU operand
        inputs.append(b.reshape(1, dout).astype(jnp.float32))   # f32 bias

    kernel = functools.partial(_fused_autoencoder_kernel, acts=acts)
    out = pl.pallas_call(
        kernel,
        out_shape=jax.ShapeDtypeStruct((B_pad, Dout_final), x.dtype),
        grid=grid,
        in_specs=in_specs,
        out_specs=pl.BlockSpec((TB, Dout_final), lambda i: (i, 0)),
        compiler_params=pltpu.CompilerParams(
            dimension_semantics=("parallel",),  # shard batch over v7x's 2 TCs
            vmem_limit_bytes=32 << 20,          # safe on v7x's 64 MiB VMEM
        ),
    )(*inputs)
    return out if B_pad == B else out[:B]


def init_autoencoder_params(key, dims):
    """Params matching nn.Linear default init (uniform +-1/sqrt(fan_in)).

    Returns (encoder_params, decoder_params), each a list of (W[in, out], b[out]).
    """
    def build(key, ds):
        params = []
        for i in range(len(ds) - 1):
            key, kw, kb = jax.random.split(key, 3)
            fan_in, fan_out = ds[i], ds[i + 1]
            bound = 1.0 / jnp.sqrt(float(fan_in))
            W = jax.random.uniform(kw, (fan_in, fan_out), jnp.float32, -bound, bound)
            b = jax.random.uniform(kb, (fan_out,), jnp.float32, -bound, bound)
            params.append((W, b))
        return key, params

    key, enc = build(key, dims)
    key, dec = build(key, dims[::-1])
    return enc, dec


def _reference_forward(x, enc_params, dec_params):
    """Pure-JAX f32 reference (same semantics as the PyTorch module)."""
    h = x
    for (W, b) in enc_params:
        h = jnp.maximum(h @ W + b, 0.0)
    dec = list(dec_params)
    for i, (W, b) in enumerate(dec):
        y = h @ W + b
        h = jax.nn.sigmoid(y) if i == len(dec) - 1 else jnp.maximum(y, 0.0)
    return h


if __name__ == "__main__":
    dims = [64, 32, 16]          # AutoEncoder(dims): 64 -> 32 -> 16 -> 32 -> 64
    batch = 8

    key = jax.random.PRNGKey(0)
    key, kx = jax.random.split(key)
    x = jax.random.normal(kx, (batch, dims[0]), jnp.float32)

    enc_params, dec_params = init_autoencoder_params(key, dims)

    fwd = jax.jit(lambda x: autoencoder_forward(x, enc_params, dec_params))
    out = fwd(x)
    jax.block_until_ready(out)

    assert out.shape == (batch, dims[0])
    assert bool(jnp.all(out >= 0.0)) and bool(jnp.all(out <= 1.0))  # sigmoid range

    # Numerics: bf16 MXU inputs vs f32 reference — generous tolerance.
    ref = _reference_forward(x, enc_params, dec_params)
    assert bool(jnp.allclose(out, ref, atol=5e-2, rtol=5e-2))

    print("KERNEL_OK")
</pallas_src>

<mosaic_0001>
module attributes {stable_mosaic.version = 11 : i64} {
  func.func @_fused_autoencoder_kernel(%arg0: i32, %arg1: memref<8x64xf32, #tpu.memory_space<vmem>>, %arg2: memref<64x32xbf16, #tpu.memory_space<vmem>>, %arg3: memref<1x32xf32, #tpu.memory_space<vmem>>, %arg4: memref<32x16xbf16, #tpu.memory_space<vmem>>, %arg5: memref<1x16xf32, #tpu.memory_space<vmem>>, %arg6: memref<16x32xbf16, #tpu.memory_space<vmem>>, %arg7: memref<1x32xf32, #tpu.memory_space<vmem>>, %arg8: memref<32x64xbf16, #tpu.memory_space<vmem>>, %arg9: memref<1x64xf32, #tpu.memory_space<vmem>>, %arg10: memref<8x64xf32, #tpu.memory_space<vmem>>) attributes {dimension_semantics = [#tpu.dimension_semantics<parallel>], iteration_bounds = array<i64: 1>, scalar_prefetch = 0 : i64, scratch_operands = 0 : i64, tpu.core_type = #tpu.core_type<tc>, window_params = [{transform_indices = @transform_0, window_bounds = array<i64: 8, 64>}, {pipeline_mode = #tpu.pipeline_mode<synchronous>, transform_indices = @transform_1, window_bounds = array<i64: 64, 32>}, {pipeline_mode = #tpu.pipeline_mode<synchronous>, transform_indices = @transform_2, window_bounds = array<i64: 1, 32>}, {pipeline_mode = #tpu.pipeline_mode<synchronous>, transform_indices = @transform_3, window_bounds = array<i64: 32, 16>}, {pipeline_mode = #tpu.pipeline_mode<synchronous>, transform_indices = @transform_4, window_bounds = array<i64: 1, 16>}, {pipeline_mode = #tpu.pipeline_mode<synchronous>, transform_indices = @transform_5, window_bounds = array<i64: 16, 32>}, {pipeline_mode = #tpu.pipeline_mode<synchronous>, transform_indices = @transform_6, window_bounds = array<i64: 1, 32>}, {pipeline_mode = #tpu.pipeline_mode<synchronous>, transform_indices = @transform_7, window_bounds = array<i64: 32, 64>}, {pipeline_mode = #tpu.pipeline_mode<synchronous>, transform_indices = @transform_8, window_bounds = array<i64: 1, 64>}, {transform_indices = @transform_9, window_bounds = array<i64: 8, 64>}]} {
    %c0 = arith.constant 0 : index
    %c0_0 = arith.constant 0 : index
    %0 = vector.load %arg1[%c0, %c0_0] : memref<8x64xf32, #tpu.memory_space<vmem>>, vector<8x64xf32>
    %1 = arith.truncf %0 : vector<8x64xf32> to vector<8x64xbf16>
    %c0_1 = arith.constant 0 : index
    %c0_2 = arith.constant 0 : index
    %2 = vector.load %arg2[%c0_1, %c0_2] : memref<64x32xbf16, #tpu.memory_space<vmem>>, vector<64x32xbf16>
    %cst = arith.constant dense<0.000000e+00> : vector<8x32xf32>
    %3 = tpu.matmul %1, %2, %cst {dimension_numbers = #tpu.dot_dimension_numbers<[1], [0], [0], [1], [0, 0, 1, 1], [], []>} : vector<8x64xbf16>, vector<64x32xbf16>, vector<8x32xf32> -> vector<8x32xf32>
    %c0_3 = arith.constant 0 : index
    %c0_4 = arith.constant 0 : index
    %4 = vector.load %arg3[%c0_3, %c0_4] : memref<1x32xf32, #tpu.memory_space<vmem>>, vector<1x32xf32>
    %5 = vector.broadcast %4 : vector<1x32xf32> to vector<8x32xf32>
    %6 = arith.addf %3, %5 : vector<8x32xf32>
    %cst_5 = arith.constant 0.000000e+00 : f32
    %7 = vector.broadcast %cst_5 : f32 to vector<8x32xf32>
    %8 = arith.maximumf %6, %7 : vector<8x32xf32>
    %9 = arith.truncf %8 : vector<8x32xf32> to vector<8x32xbf16>
    %c0_6 = arith.constant 0 : index
    %c0_7 = arith.constant 0 : index
    %10 = vector.load %arg4[%c0_6, %c0_7] : memref<32x16xbf16, #tpu.memory_space<vmem>>, vector<32x16xbf16>
    %cst_8 = arith.constant dense<0.000000e+00> : vector<8x16xf32>
    %11 = tpu.matmul %9, %10, %cst_8 {dimension_numbers = #tpu.dot_dimension_numbers<[1], [0], [0], [1], [0, 0, 1, 1], [], []>} : vector<8x32xbf16>, vector<32x16xbf16>, vector<8x16xf32> -> vector<8x16xf32>
    %c0_9 = arith.constant 0 : index
    %c0_10 = arith.constant 0 : index
    %12 = vector.load %arg5[%c0_9, %c0_10] : memref<1x16xf32, #tpu.memory_space<vmem>>, vector<1x16xf32>
    %13 = vector.broadcast %12 : vector<1x16xf32> to vector<8x16xf32>
    %14 = arith.addf %11, %13 : vector<8x16xf32>
    %cst_11 = arith.constant 0.000000e+00 : f32
    %15 = vector.broadcast %cst_11 : f32 to vector<8x16xf32>
    %16 = arith.maximumf %14, %15 : vector<8x16xf32>
    %17 = arith.truncf %16 : vector<8x16xf32> to vector<8x16xbf16>
    %c0_12 = arith.constant 0 : index
    %c0_13 = arith.constant 0 : index
    %18 = vector.load %arg6[%c0_12, %c0_13] : memref<16x32xbf16, #tpu.memory_space<vmem>>, vector<16x32xbf16>
    %cst_14 = arith.constant dense<0.000000e+00> : vector<8x32xf32>
    %19 = tpu.matmul %17, %18, %cst_14 {dimension_numbers = #tpu.dot_dimension_numbers<[1], [0], [0], [1], [0, 0, 1, 1], [], []>} : vector<8x16xbf16>, vector<16x32xbf16>, vector<8x32xf32> -> vector<8x32xf32>
    %c0_15 = arith.constant 0 : index
    %c0_16 = arith.constant 0 : index
    %20 = vector.load %arg7[%c0_15, %c0_16] : memref<1x32xf32, #tpu.memory_space<vmem>>, vector<1x32xf32>
    %21 = vector.broadcast %20 : vector<1x32xf32> to vector<8x32xf32>
    %22 = arith.addf %19, %21 : vector<8x32xf32>
    %cst_17 = arith.constant 0.000000e+00 : f32
    %23 = vector.broadcast %cst_17 : f32 to vector<8x32xf32>
    %24 = arith.maximumf %22, %23 : vector<8x32xf32>
    %25 = arith.truncf %24 : vector<8x32xf32> to vector<8x32xbf16>
    %c0_18 = arith.constant 0 : index
    %c0_19 = arith.constant 0 : index
    %26 = vector.load %arg8[%c0_18, %c0_19] : memref<32x64xbf16, #tpu.memory_space<vmem>>, vector<32x64xbf16>
    %cst_20 = arith.constant dense<0.000000e+00> : vector<8x64xf32>
    %27 = tpu.matmul %25, %26, %cst_20 {dimension_numbers = #tpu.dot_dimension_numbers<[1], [0], [0], [1], [0, 0, 1, 1], [], []>} : vector<8x32xbf16>, vector<32x64xbf16>, vector<8x64xf32> -> vector<8x64xf32>
    %c0_21 = arith.constant 0 : index
    %c0_22 = arith.constant 0 : index
    %28 = vector.load %arg9[%c0_21, %c0_22] : memref<1x64xf32, #tpu.memory_space<vmem>>, vector<1x64xf32>
    %29 = vector.broadcast %28 : vector<1x64xf32> to vector<8x64xf32>
    %30 = arith.addf %27, %29 : vector<8x64xf32>
    %31 = arith.negf %30 : vector<8x64xf32>
    %32 = math.exp %31 : vector<8x64xf32>
    %cst_23 = arith.constant 1.000000e+00 : f32
    %33 = vector.broadcast %cst_23 : f32 to vector<8x64xf32>
    %34 = arith.addf %33, %32 : vector<8x64xf32>
    %35 = arith.divf %33, %34 : vector<8x64xf32>
    %c0_24 = arith.constant 0 : index
    %c0_25 = arith.constant 0 : index
    %36 = vector.load %arg10[%c0_24, %c0_25] : memref<8x64xf32, #tpu.memory_space<vmem>>, vector<8x64xf32>
    tpu.vector_store %arg10[%c0_24, %c0_25], %35 {strides = array<i32>} : memref<8x64xf32, #tpu.memory_space<vmem>>, vector<8x64xf32>,
    return
  }
  func.func @transform_0(%arg0: i32) -> (i32, i32) {
    %c0_i32 = arith.constant 0 : i32
    %c0_i32_0 = arith.constant 0 : i32
    return %arg0, %c0_i32 : i32, i32
  }
  func.func @transform_1(%arg0: i32) -> (i32, i32) {
    %c0_i32 = arith.constant 0 : i32
    %c0_i32_0 = arith.constant 0 : i32
    %c0_i32_1 = arith.constant 0 : i32
    return %c0_i32, %c0_i32_0 : i32, i32
  }
  func.func @transform_2(%arg0: i32) -> (i32, i32) {
    %c0_i32 = arith.constant 0 : i32
    %c0_i32_0 = arith.constant 0 : i32
    %c0_i32_1 = arith.constant 0 : i32
    return %c0_i32, %c0_i32_0 : i32, i32
  }
  func.func @transform_3(%arg0: i32) -> (i32, i32) {
    %c0_i32 = arith.constant 0 : i32
    %c0_i32_0 = arith.constant 0 : i32
    %c0_i32_1 = arith.constant 0 : i32
    return %c0_i32, %c0_i32_0 : i32, i32
  }
  func.func @transform_4(%arg0: i32) -> (i32, i32) {
    %c0_i32 = arith.constant 0 : i32
    %c0_i32_0 = arith.constant 0 : i32
    %c0_i32_1 = arith.constant 0 : i32
    return %c0_i32, %c0_i32_0 : i32, i32
  }
  func.func @transform_5(%arg0: i32) -> (i32, i32) {
    %c0_i32 = arith.constant 0 : i32
    %c0_i32_0 = arith.constant 0 : i32
    %c0_i32_1 = arith.constant 0 : i32
    return %c0_i32, %c0_i32_0 : i32, i32
  }
  func.func @transform_6(%arg0: i32) -> (i32, i32) {
    %c0_i32 = arith.constant 0 : i32
    %c0_i32_0 = arith.constant 0 : i32
    %c0_i32_1 = arith.constant 0 : i32
    return %c0_i32, %c0_i32_0 : i32, i32
  }
  func.func @transform_7(%arg0: i32) -> (i32, i32) {
    %c0_i32 = arith.constant 0 : i32
    %c0_i32_0 = arith.constant 0 : i32
    %c0_i32_1 = arith.constant 0 : i32
    return %c0_i32, %c0_i32_0 : i32, i32
  }
  func.func @transform_8(%arg0: i32) -> (i32, i32) {
    %c0_i32 = arith.constant 0 : i32
    %c0_i32_0 = arith.constant 0 : i32
    %c0_i32_1 = arith.constant 0 : i32
    return %c0_i32, %c0_i32_0 : i32, i32
  }
  func.func @transform_9(%arg0: i32) -> (i32, i32) {
    %c0_i32 = arith.constant 0 : i32
    %c0_i32_0 = arith.constant 0 : i32
    return %arg0, %c0_i32 : i32, i32
  }
}

</mosaic_0001>

<bundles_post_ra>
// kernel: _lambda_.1
= control target key start
LH: loop header
LB: loop body
LE: loop exit
PB: predicated region body
PF: predicated region fallthrough
CT: control target
= control target key end

     0   :  { %14 = vsyncpa [#allocation3], 0  ;;  %s765_s0 = inlined_call_operand.hbm [shape: f32[8,64], index: 0, kind: input, shape index: {}]   ;;  %s766_s1 = inlined_call_operand.hbm [shape: bf16[64,32], index: 1, kind: input, shape index: {}]   ;;  %s767_s2 = inlined_call_operand.hbm [shape: f32[1,32], index: 2, kind: input, shape index: {}]   ;;  %s768_s3 = inlined_call_operand.hbm [shape: bf16[32,16], index: 3, kind: input, shape index: {}]   ;;  %s769_s4 = inlined_call_operand.hbm [shape: f32[1,16], index: 4, kind: input, shape index: {}]   ;;  %s770_s5 = inlined_call_operand.vmem [shape: bf16[16,32], index: 5, kind: input, shape index: {}]   ;;  %s771_s6 = inlined_call_operand.vmem [shape: f32[1,32], index: 6, kind: input, shape index: {}]   ;;  %s772_s7 = inlined_call_operand.hbm [shape: bf16[32,64], index: 7, kind: input, shape index: {}]   ;;  %s773_s8 = inlined_call_operand.vmem [shape: f32[1,64], index: 8, kind: input, shape index: {}]   ;;  %s774_s9 = inlined_call_operand.hbm [shape: f32[8,64], index: 9, kind: output, shape index: {}]  }
   0x1   :  { %15 = vsyncpa [#allocation6], 0 }
   0x2   :  { %16 = vsyncpa [#allocation9], 0 }
   0x3   :  { %17 = vsyncpa [#allocation12], 0 }
   0x4   :  { %18 = vsyncpa [#allocation4], 0  ;;  %s657_s30 = smov [#allocation5]  }
   0x5   :  { %s34_s10 = sshll.u32 %s657_s30, 4  ;;  %s35_s10 = int_to_ptr.vmem [resolvable:$true] %s34_s10 }
   0x6   :  { %s515_s11 = scalar_lea.vmem %s35_s10, 512  ;;  %p520_p1 = scmp.lt.s32.totalorder %s35_s10, %s35_s10 }
   0x7   :  { %p516_p0 = scmp.ne.s32.totalorder %s35_s10, %s515_s11  ;;  %p521_p2 = scmp.lt.s32.totalorder %s515_s11, %s515_s11 }
   0x9   :  { %p522_p3 = por %p521_p2, %p520_p1 }
   0xb   :  { %p523_p4 = pnand %p522_p3, %p516_p0 }
   0xd   :  { %526 = shalt.err (!%p523_p4)
}
   0xe   :  { %s658_s12 = smov 64   ;;  %s659_s13 = smov 4  }
   0xf   :  { %40 = dma.hbm_to_vmem [thread:$0]  %s766_s1, 512, %s35_s10, [#allocation6], %s658_s12, %s658_s12, %s659_s13  }
  0x10   :  { %s660_s16 = smov [#allocation8]   ;;  %s661_s18 = smov [#allocation2]  }
  0x11   :  { %s56_s17 = sshll.u32 %s660_s16, 4  ;;  %s25_s19 = sshll.u32 %s661_s18, 4  ;;  %s57_s17 = int_to_ptr.vmem [resolvable:$true] %s56_s17  ;;  %s26_s19 = int_to_ptr.vmem [resolvable:$true] %s25_s19 }
  0x12   :  { %s535_s20 = scalar_lea.vmem %s57_s17, 256  ;;  %p540_p6 = scmp.lt.s32.totalorder %s57_s17, %s57_s17 }
  0x13   :  { %p536_p5 = scmp.ne.s32.totalorder %s57_s17, %s535_s20  ;;  %p541_p7 = scmp.lt.s32.totalorder %s535_s20, %s535_s20 }
  0x15   :  { %p542_p8 = por %p541_p7, %p540_p6 }
  0x17   :  { %p543_p9 = pnand %p542_p8, %p536_p5 }
  0x19   :  { %546 = shalt.err (!%p543_p9)
}
  0x1a   :  { %62 = dma.hbm_to_vmem [thread:$0]  %s768_s3, 256, %s57_s17, [#allocation9], %s658_s12, %s658_s12, %s659_s13  }
  0x1b   :  { %s555_s1 = scalar_lea.vmem %s26_s19, 128  ;;  %p560_p11 = scmp.lt.s32.totalorder %s26_s19, %s26_s19 }
  0x1c   :  { %p556_p10 = scmp.ne.s32.totalorder %s26_s19, %s555_s1  ;;  %p561_p12 = scmp.lt.s32.totalorder %s555_s1, %s555_s1 }
  0x1e   :  { %p562_p13 = por %p561_p12, %p560_p11 }
  0x20   :  { %p563_p0 = pnand %p562_p13, %p556_p10 }
  0x22   :  { %566 = shalt.err (!%p563_p0)
}
  0x23   :  { %28 = dma.hbm_to_vmem [thread:$0]  %s765_s0, 128, %s26_s19, [#allocation3]  }
  0x24   :  { %s662_s25 = smov [#allocation7]   ;;  %s663_s27 = smov [#allocation10]  }
  0x25   :  { %s47_s26 = sshll.u32 %s662_s25, 4  ;;  %s69_s28 = sshll.u32 %s663_s27, 4  ;;  %s48_s26 = int_to_ptr.vmem [resolvable:$true] %s47_s26  ;;  %s70_s28 = int_to_ptr.vmem [resolvable:$true] %s69_s28 }
  0x26   :  { %s575_s29 = scalar_lea.vmem %s48_s26, 16  ;;  %s579_s3 = scalar_lea.vmem %s48_s26, 32 }
  0x27   :  { %p576_p1 = scmp.ne.s32.totalorder %s48_s26, %s575_s29  ;;  %p580_p2 = scmp.lt.s32.totalorder %s48_s26, %s48_s26 }
  0x28   :  { %p581_p3 = scmp.lt.s32.totalorder %s579_s3, %s575_s29 }
  0x2a   :  { %p582_p4 = por %p581_p3, %p580_p2 }
  0x2c   :  { %p583_p5 = pnand %p582_p4, %p576_p1 }
  0x2e   :  { %586 = shalt.err (!%p583_p5)
}
  0x2f   :  { %50 = dma.hbm_to_vmem [thread:$0]  %s767_s2, 16, %s48_s26, [#allocation6]  }
  0x30   :  { %s595_s11 = scalar_lea.vmem %s70_s28, 16  ;;  %s599_s0 = scalar_lea.vmem %s70_s28, 32 }
  0x31   :  { %p596_p6 = scmp.ne.s32.totalorder %s70_s28, %s595_s11  ;;  %p600_p7 = scmp.lt.s32.totalorder %s70_s28, %s70_s28 }
  0x32   :  { %p601_p8 = scmp.lt.s32.totalorder %s599_s0, %s595_s11 }
  0x34   :  { %p602_p9 = por %p601_p8, %p600_p7 }
  0x36   :  { %p603_p10 = pnand %p602_p9, %p596_p6 }
  0x38   :  { %606 = shalt.err (!%p603_p10)
}
  0x39   :  { %72 = dma.hbm_to_vmem [thread:$0]  %s769_s4, 16, %s70_s28, [#allocation9]  }
  0x3a   :  { %s664_s16 = smov [#allocation11]  }
  0x3b   :  { %s82_s17 = sshll.u32 %s664_s16, 4  ;;  %s83_s17 = int_to_ptr.vmem [resolvable:$true] %s82_s17 }
  0x3c   :  { %s615_s18 = scalar_lea.vmem %s83_s17, 256  ;;  %p620_p12 = scmp.lt.s32.totalorder %s83_s17, %s83_s17 }
  0x3d   :  { %p616_p11 = scmp.ne.s32.totalorder %s83_s17, %s615_s18  ;;  %p621_p13 = scmp.lt.s32.totalorder %s615_s18, %s615_s18 }
  0x3f   :  { %p622_p0 = por %p621_p13, %p620_p12 }
  0x41   :  { %p623_p1 = pnand %p622_p0, %p616_p11 }
  0x43   :  { %626 = shalt.err (!%p623_p1)
}
  0x44   :  { %88 = dma.hbm_to_vmem [thread:$0]  %s772_s7, 256, %s83_s17, [#allocation12], %s658_s12, %s658_s12, %s659_s13  }
  0x45   :  { %647 = dma.done.wait [#allocation3], 128  }
  0x46   :  { %648 = vsyncadd [#allocation3], 4294967168 }
  0x47   :  { %649 = dma.done.wait [#allocation6], 528  }
  0x48   :  { %650 = vsyncadd [#allocation6], 4294966768 }
  0x49   :  { %651 = dma.done.wait [#allocation9], 272  }
  0x4a   :  { %652 = vsyncadd [#allocation9], 4294967024 }
  0x4b   :  { %653 = dma.done.wait [#allocation12], 256  }
  0x4c   :  { %654 = vsyncadd [#allocation12], 4294967040  ;;  %v665_v0 = vmov 0.0   ;;  %vm666_vm0 = vmmov 0   ;;  %v494_v1 = vld [vmem:[#allocation5 + $0x18] sm:$0xff]   ;;  %v495_v2 = vld [vmem:[#allocation5 + $0x10] sm:$0xff]  }
  0x4d   :  { %449 = vmatprep.subr.bf16.mxu0 %v665_v0  ;;  %457 = vmatprep.mubr.msk.bf16.mxu0 %vm666_vm0, %v665_v0  ;;  %v496_v3 = vld [vmem:[#allocation5 + $0x8] sm:$0xff]   ;;  %v497_v4 = vld [vmem:[#allocation5] sm:$0xff]   ;;  %v110_v5 = vld [vmem:[#allocation2] sm:$0xff]  ;;  %vm151_vm1 = vcmask 523264   ;;  %vm220_vm2 = vcmask 261120   ;;  %vm281_vm3 = vcmask 130048  }
  0x4e   :  { %461 = vmatprep.subr.bf16.mxu1 %v665_v0  ;;  %465 = vmatprep.mubr.msk.bf16.mxu1 %vm666_vm0, %v665_v0  ;;  %v111_v6 = vpack.c.bf16 %v110_v5, %v110_v5  ;;  %v498_v7 = vld [vmem:[#allocation8 + $0x8] sm:$0xff]   ;;  %v499_v8 = vld [vmem:[#allocation8] sm:$0xff]   ;;  %v418_v9 = vld [vmem:[#allocation7] ss:$0 sm:$0xff] }
  0x4f   :  { %450 = vmatpush3.bf16.msra.mxu0 %v494_v1  ;;  %462 = vmatpush3.bf16.msra.mxu1 %v498_v7  ;;  %v500_v15 = vld [vmem:[%s770_s5] sm:$0xff]   ;;  %v424_v19 = vld [vmem:[#allocation10] ss:$0 sm:$0xff] }
  0x50   :  { %451 = vmatprep.subr.bf16.mxu0 %v665_v0  ;;  %463 = vmatprep.subr.bf16.mxu1 %v665_v0  ;;  %v501_v18 = vld [vmem:[#allocation11 + $0x8] sm:$0xff]   ;;  %v502_v27 = vld [vmem:[#allocation11] sm:$0xff]  }
  0x51   :  { %v428_v28 = vld [vmem:[%s771_s6] ss:$0 sm:$0xff]  ;;  %s667_s6 = smov [#allocation13]  }
  0x52   :  { %v431_v36 = vld [vmem:[%s773_s8] ss:$0 sm:$0xff]  ;;  %s406_s21 = sshll.u32 %s667_s6, 4  ;;  %s407_s21 = int_to_ptr.vmem [resolvable:$true] %s406_s21 }
  0x53   :  { %452 = vmatpush3.bf16.msra.mxu0 %v495_v2  ;;  %464 = vmatpush3.bf16.msra.mxu1 %v499_v8  ;;  %s627_s22 = scalar_lea.vmem %s407_s21, 128  ;;  %p632_p3 = scmp.lt.s32.totalorder %s407_s21, %s407_s21 }
  0x54   :  { %453 = vmatprep.subr.bf16.mxu0 %v665_v0  ;;  %469 = vmatprep.subr.bf16.mxu1 %v665_v0  ;;  %p628_p2 = scmp.ne.s32.totalorder %s407_s21, %s627_s22  ;;  %p633_p4 = scmp.lt.s32.totalorder %s627_s22, %s627_s22 }
  0x56   :  { %p634_p5 = por %p633_p4, %p632_p3 }
  0x57   :  { %454 = vmatpush3.bf16.msra.mxu0 %v496_v3 }
  0x58   :  { %455 = vmatprep.subr.bf16.mxu0 %v665_v0  ;;  %p635_p6 = pnand %p634_p5, %p628_p2 }
  0x5b   :  { %456 = vmatpush3.bf16.msra.mxu0 %v497_v4 }
  0x5c   :  { %475 = vmatprep.subr.bf16.mxu0 %v665_v0 }
  0x5e   :  { %458 = vmatmul.mubr.msk.bf16.vlgmr.msra.gmra.mxu0 %vm151_vm1, %v111_v6 }
  0x5f   :  { %479 = vmatprep.mubr.msk.bf16.mxu0 %vm666_vm0, %v665_v0  ;;  %476 = vmatpush3.bf16.msra.mxu0 %v501_v18 }
  0x60   :  { %477 = vmatprep.subr.bf16.mxu0 %v665_v0 }
  0x63   :  { %478 = vmatpush3.bf16.msra.mxu0 %v502_v27 }
 0x11e   :  { %v189_v10 = vpop.f32.mrf.mxu0 }
 0x11f   :  { %v190_v11 = vadd.f32 %v418_v9, %v189_v10 }
 0x120   :  { %v459_v12 = vpop.f32.mrf.mxu0 }
 0x121   :  { %v195_v13 = vmax.f32 %v190_v11, 0.0 }
 0x122   :  { %v192_v14 = vpop.f32.mrf.mxu0 }
 0x123   :  { %v196_v16 = vpack.c.bf16 %v195_v13, %v195_v13 }
 0x124   :  { %v460_v17 = vpop.f32.mrf.mxu0 }
 0x125   :  { %466 = vmatmul.mubr.msk.bf16.vlgmr.msra.gmra.mxu1 %vm220_vm2, %v196_v16 }
 0x126   :  { %470 = vmatpush3.bf16.msra.mxu1 %v500_v15  ;;  %471 = vmatprep.mubr.msk.bf16.mxu1 %vm666_vm0, %v665_v0 }
 0x1e5   :  { %v258_v20 = vpop.f32.mrf.mxu1 }
 0x1e6   :  { %v259_v21 = vadd.f32 %v424_v19, %v258_v20 }
 0x1e7   :  { %v467_v22 = vpop.f32.mrf.mxu1 }
 0x1e8   :  { %v264_v23 = vmax.f32 %v259_v21, 0.0 }
 0x1e9   :  { %v261_v24 = vpop.f32.mrf.mxu1 }
 0x1ea   :  { %v265_v25 = vpack.c.bf16 %v264_v23, %v264_v23 }
 0x1eb   :  { %v468_v26 = vpop.f32.mrf.mxu1 }
 0x1ec   :  { %472 = vmatmul.mubr.msk.bf16.vlgmr.msra.gmra.mxu1 %vm281_vm3, %v265_v25 }
 0x2ac   :  { %v319_v29 = vpop.f32.mrf.mxu1 }
 0x2ad   :  { %v320_v30 = vadd.f32 %v428_v28, %v319_v29 }
 0x2ae   :  { %v473_v31 = vpop.f32.mrf.mxu1 }
 0x2af   :  { %v325_v32 = vmax.f32 %v320_v30, 0.0 }
 0x2b0   :  { %v322_v33 = vpop.f32.mrf.mxu1 }
 0x2b1   :  { %v326_v34 = vpack.c.bf16 %v325_v32, %v325_v32 }
 0x2b2   :  { %v474_v35 = vpop.f32.mrf.mxu1 }
 0x2b3   :  { %480 = vmatmul.mubr.msk.bf16.vlgmr.msra.gmra.mxu0 %vm220_vm2, %v326_v34 }
 0x373   :  { %v387_v37 = vpop.f32.mrf.mxu0 }
 0x374   :  { %v388_v38 = vadd.f32 %v431_v36, %v387_v37 }
 0x375   :  { %v481_v39 = vpop.f32.mrf.mxu0 }
 0x376   :  { %v435_v40 = vmul.f32 -1.442695, %v388_v38 }
 0x377   :  { %v390_v41 = vpop.f32.mrf.mxu0 }
 0x378   :  { %503 = vpow2.f32 %v435_v40 }
 0x379   :  { %v482_v42 = vpop.f32.mrf.mxu0 }
 0x385   :  { %v504_v43 = vpop.eup %503 }
 0x386   :  { %v396_v44 = vadd.f32 1.0, %v504_v43 }
 0x388   :  { %505 = vrcp.f32 %v396_v44 }
 0x395   :  { %v506_v45 = vpop.eup %505 }
 0x396   :  { %399 = vst.msk [vmem:[#allocation13] sm:$0xff] %vm151_vm1, %v506_v45 }
 0x397   :  { %638 = shalt.err (!%p635_p6)
}
 0x398   :  { %409 = dma.vmem_to_hbm [thread:$0]  %s407_s21, 128, %s774_s9, [#allocation4]  }
 0x399   :  { %655 = dma.done.wait [#allocation4], 128  }
 0x39a   :  { %656 = vsyncadd [#allocation4], 4294967168 }
 0x39b   :  { %413 = vsyncpa [#allocation3], 1 }
 0x39c   :  { %414 = vsyncpa [#allocation6], 1 }
 0x39d   :  { %415 = vsyncpa [#allocation9], 1 }
 0x39e   :  { %416 = vsyncpa [#allocation12], 1 }
 0x39f   :  { %417 = vsyncpa [#allocation4], 1 }

</bundles_post_ra>
